<compile_context>
chip_gen: v6e
topology: v6e:2x2x1
jax: 0.10.0
libtpu: 0.0.40
codegen_flags: <defaults>
</compile_context>

<pallas_src>
import functools

import jax
import jax.numpy as jnp
from jax.experimental import pallas as pl
from jax.experimental.pallas import tpu as pltpu


# ---------------------------------------------------------------------------
# Stage 1: per-batch q/k/v projections (1x1 convs == channel matmuls).
# ---------------------------------------------------------------------------
def projection_kernel(x_ref, wqk_ref, wv_ref, q_ref, k_ref, vaug_ref):
    # x_ref:    (1, C, Np)   bf16
    # wqk_ref:  (2*C8, C)    bf16  (query and key weights fused: one tall matmul)
    # wv_ref:   (C, C)       bf16
    # q_ref:    (1, C8, Np)  bf16
    # k_ref:    (1, C8, Np)  bf16
    # vaug_ref: (1, C+8, Np) bf16  (row C is ones -> softmax denominator row)
    c8 = q_ref.shape[1]
    c = vaug_ref.shape[1] - 8
    n = vaug_ref.shape[2]

    x_bf = x_ref[0]                                                   # (C, Np)
    qk = jnp.dot(wqk_ref[...], x_bf,
                 preferred_element_type=jnp.float32)                  # (2*C8, Np)
    q_ref[0] = qk[:c8, :].astype(jnp.bfloat16)
    k_ref[0] = qk[c8:, :].astype(jnp.bfloat16)

    v = jnp.dot(wv_ref[...], x_bf,
                preferred_element_type=jnp.float32)                   # (C, Np)
    vaug_ref[0, pl.ds(0, c), :] = v.astype(jnp.bfloat16)
    # Row C = ones (so the V matmul also produces the exp column sums);
    # rows C+1..C+7 = zeros (sublane padding).
    ones_row = (jax.lax.broadcasted_iota(jnp.int32, (8, n), 0) == 0)
    vaug_ref[0, pl.ds(c, 8), :] = ones_row.astype(jnp.bfloat16)


# ---------------------------------------------------------------------------
# Stage 2: column-tiled attention + residual.
# ---------------------------------------------------------------------------
def attention_kernel(gamma_ref, qt_ref, k_ref, vaug_ref, xres_ref, o_ref, *,
                     n_valid, n_padded, exp_dtype):
    # gamma_ref: (1, 1)       f32 in SMEM
    # qt_ref:    (1, Np, C8)  bf16, resident across j
    # k_ref:     (1, C8, tn)  bf16 column tile
    # vaug_ref:  (1, C+8, Np) bf16, resident across j
    # xres_ref:  (1, C, tn)   f32 residual column tile
    # o_ref:     (1, C, tn)   f32 output column tile (lane-dense: tn % 128 == 0)
    c = o_ref.shape[1]

    # scores[i, t] = sum_d q[i, d] * k[d, t]  — plain MXU dot, f32 accumulate.
    scores = jnp.dot(qt_ref[0], k_ref[0],
                     preferred_element_type=jnp.float32)              # (Np, tn)
    if n_valid < n_padded:                                            # static
        row = jax.lax.broadcasted_iota(jnp.int32, scores.shape, 0)
        scores = jnp.where(row < n_valid, scores, -1e30)

    # Exact softmax over the row axis i (torch softmax dim=1): the whole
    # reduction axis is resident inside each column tile.  exp in bf16 on
    # chips with a bf16 EUP (v6e/v7x), f32 on v5e; normalization deferred.
    m = jnp.max(scores, axis=0, keepdims=True)                        # (1, tn)
    e = jnp.exp((scores - m).astype(exp_dtype)).astype(jnp.bfloat16)  # (Np, tn)

    # out_aug[:C] = V @ e (numerator); out_aug[C] = sum_i e[i, :] (denominator,
    # via the ones row of v_aug) — one MXU pass, no separate reduction.
    out_aug = jnp.dot(vaug_ref[0], e,
                      preferred_element_type=jnp.float32)             # (C+8, tn)
    num = out_aug[:c, :]
    den = out_aug[c:c + 1, :]                                         # (1, tn)
    out = num * pl.reciprocal(den, approx=True)

    gamma = gamma_ref[0, 0]
    o_ref[0] = (gamma * out + xres_ref[0]).astype(o_ref.dtype)


# ---------------------------------------------------------------------------
# Wrapper helpers.
# ---------------------------------------------------------------------------
def _vmem_capacity_bytes():
    try:
        cap = getattr(pltpu.get_tpu_info(), "vmem_capacity_bytes", None)
        return int(cap) if cap else None
    except Exception:
        return None


def _vmem_limit_bytes():
    cap = _vmem_capacity_bytes()
    if cap is None:
        return None                        # keep the compiler's default limit
    # Raise the scoped limit above the 16/32 MiB default, ~8 MiB headroom.
    return max(32 * 1024 * 1024, cap - 8 * 1024 * 1024)


def _has_bf16_eup():
    # v6e / v7x have a bf16 EUP path (~2x exp throughput); v5e and older do not.
    try:
        kind = jax.devices()[0].device_kind.lower()
    except Exception:
        return False
    return not any(v in kind for v in ("v2", "v3", "v4", "v5"))


def _choose_tiling(n, tn=None):
    """Return (padded_n, tn): tn is a multiple of 128 that divides padded_n."""
    if tn is not None:
        assert tn % 128 == 0, "column tile must be a multiple of 128 lanes"
        return -(-n // tn) * tn, tn
    cap = _vmem_capacity_bytes()
    max_tn = 512
    if cap is not None and cap <= 96 * 1024 * 1024 and n >= 2048:
        max_tn = 256        # v7x (64 MiB VMEM): keep (N, tn) temporaries small
    if n % 128 == 0:
        best = 128
        for cand in range(128, min(n, max_tn) + 1, 128):
            if n % cand == 0:
                best = cand
        return n, best
    # No lane-dense divisor: pad N up to a multiple of 128 (masked in-kernel),
    # never emit a non-128-multiple output lane width.
    return -(-n // 128) * 128, 128


def self_attention(x, wq, wk, wv, gamma, *, tn=None):
    """SAGAN self-attention forward.
    x: (B, C, H, W) f32, wq/wk: (C//8, C), wv: (C, C), gamma: scalar."""
    B, C, H, W = x.shape
    N = H * W
    C8 = wq.shape[0]
    assert C % 8 == 0 and wq.shape == (C8, C) and wk.shape == (C8, C)
    assert wv.shape == (C, C)

    Np, tn = _choose_tiling(N, tn)
    J = Np // tn

    xf = x.reshape(B, C, N).astype(jnp.float32)
    if Np != N:
        xf = jnp.pad(xf, ((0, 0), (0, 0), (0, Np - N)))
    x_bf = xf.astype(jnp.bfloat16)
    wqk = jnp.concatenate([wq, wk], axis=0).astype(jnp.bfloat16)      # (2*C8, C)
    wv_b = wv.astype(jnp.bfloat16)
    gamma_arr = jnp.reshape(jnp.asarray(gamma, jnp.float32), (1, 1))
    vmem_limit = _vmem_limit_bytes()

    # ---- stage 1: per-batch projections ------------------------------------
    q, k, vaug = pl.pallas_call(
        projection_kernel,
        out_shape=(
            jax.ShapeDtypeStruct((B, C8, Np), jnp.bfloat16),
            jax.ShapeDtypeStruct((B, C8, Np), jnp.bfloat16),
            jax.ShapeDtypeStruct((B, C + 8, Np), jnp.bfloat16),
        ),
        grid_spec=pltpu.PrefetchScalarGridSpec(
            num_scalar_prefetch=0,
            grid=(B,),
            in_specs=[
                pl.BlockSpec((1, C, Np), lambda b: (b, 0, 0)),        # x (bf16)
                pl.BlockSpec((2 * C8, C), lambda b: (0, 0)),          # Wq|Wk
                pl.BlockSpec((C, C), lambda b: (0, 0)),               # Wv
            ],
            out_specs=(
                pl.BlockSpec((1, C8, Np), lambda b: (b, 0, 0)),       # q
                pl.BlockSpec((1, C8, Np), lambda b: (b, 0, 0)),       # k
                pl.BlockSpec((1, C + 8, Np), lambda b: (b, 0, 0)),    # v + ones row
            ),
        ),
        compiler_params=pltpu.CompilerParams(
            dimension_semantics=("parallel",),
            vmem_limit_bytes=vmem_limit,
        ),
    )(x_bf, wqk, wv_b)

    # One transpose per batch element, outside the hot loop, so the per-tile
    # QK contraction is a plain jnp.dot inside the attention kernel.
    qt = jnp.swapaxes(q, 1, 2)                                        # (B, Np, C8)

    # ---- stage 2: column-tiled attention + residual -------------------------
    kern = functools.partial(
        attention_kernel, n_valid=N, n_padded=Np,
        exp_dtype=jnp.bfloat16 if _has_bf16_eup() else jnp.float32)
    out = pl.pallas_call(
        kern,
        out_shape=jax.ShapeDtypeStruct((B, C, Np), jnp.float32),
        grid_spec=pltpu.PrefetchScalarGridSpec(
            num_scalar_prefetch=0,
            grid=(B, J),
            in_specs=[
                pl.BlockSpec(memory_space=pltpu.MemorySpace.SMEM),    # gamma (1,1)
                pl.BlockSpec((1, Np, C8), lambda b, j: (b, 0, 0)),    # q^T, j-resident
                pl.BlockSpec((1, C8, tn), lambda b, j: (b, 0, j)),    # k column tile
                pl.BlockSpec((1, C + 8, Np), lambda b, j: (b, 0, 0)), # v_aug, j-resident
                pl.BlockSpec((1, C, tn), lambda b, j: (b, 0, j)),     # f32 residual tile
            ],
            out_specs=pl.BlockSpec((1, C, tn), lambda b, j: (b, 0, j)),
        ),
        compiler_params=pltpu.CompilerParams(
            # No carried scratch -> both axes independent (megacore / v7x 2 TC).
            dimension_semantics=("parallel", "parallel"),
            vmem_limit_bytes=vmem_limit,
        ),
    )(gamma_arr, qt, k, vaug, xf)

    if Np != N:
        out = out[:, :, :N]
    return out.reshape(B, C, H, W)


# ---------------------------------------------------------------------------
# Host-side helpers (spectral norm is a training-time reparameterization).
# ---------------------------------------------------------------------------
def spectral_normalize(w, n_iter=20):
    # Power-iteration estimate of the largest singular value, like torch's
    # spectral_norm; applied to the weights outside the kernel.
    v = jnp.ones((w.shape[1],), w.dtype) / jnp.sqrt(jnp.float32(w.shape[1]))
    for _ in range(n_iter):
        u = w @ v
        u = u / (jnp.linalg.norm(u) + 1e-12)
        v = w.T @ u
        v = v / (jnp.linalg.norm(v) + 1e-12)
    sigma = u @ (w @ v)
    return w / sigma


def reference(x, wq, wk, wv, gamma):
    B, C, H, W = x.shape
    N = H * W
    f = x.reshape(B, C, N)
    q = jnp.einsum("oc,bcn->bon", wq, f)
    k = jnp.einsum("oc,bcn->bon", wk, f)
    v = jnp.einsum("oc,bcn->bon", wv, f)
    qk = jnp.einsum("bdi,bdj->bij", q, k)          # (B, N, N)
    attn = jax.nn.softmax(qk, axis=1)              # softmax over dim=1
    out = jnp.einsum("bci,bij->bcj", v, attn)      # (B, C, N)
    return (gamma * out + f).reshape(B, C, H, W)


if __name__ == "__main__":
    # Lane/sublane-friendly small shapes: C8 = 8 rows, N = 256 (2 x 128 lanes).
    B, C, H, W = 2, 64, 16, 16
    C8 = C // 8

    key = jax.random.PRNGKey(0)
    kx, kq, kk, kv = jax.random.split(key, 4)

    x = jax.random.normal(kx, (B, C, H, W), dtype=jnp.float32)
    # Conv1d(C, C//8, 1, bias=False) weight is (C//8, C, 1) -> squeeze to (C//8, C).
    wq = spectral_normalize(jax.random.normal(kq, (C8, C), dtype=jnp.float32) * 0.1)
    wk = spectral_normalize(jax.random.normal(kk, (C8, C), dtype=jnp.float32) * 0.1)
    wv = spectral_normalize(jax.random.normal(kv, (C, C), dtype=jnp.float32) * 0.1)
    # Module inits gamma = 0.0 (identity output); use a nonzero deterministic
    # value so the attention path is actually exercised/verified.
    gamma = jnp.float32(0.5)

    # tn=128 -> 2 column tiles per batch element, exercising the j loop and
    # the per-batch-resident q^T / v_aug path.
    y = self_attention(x, wq, wk, wv, gamma, tn=128)
    y = jax.block_until_ready(y)

    y_ref = reference(x, wq, wk, wv, gamma)
    assert y.shape == x.shape and y.dtype == jnp.float32
    # bf16 MXU operands / bf16 exp (on v6e+) / approx reciprocal: loosened
    # tolerance vs the f32 reference.
    max_err = float(jnp.max(jnp.abs(y - y_ref)))
    assert max_err < 5e-2, f"mismatch vs JAX reference (max abs err {max_err})"

    print("KERNEL_OK")
</pallas_src>

<mosaic_0001>
module attributes {stable_mosaic.version = 11 : i64} {
  func.func @projection_kernel(%arg0: i32, %arg1: memref<1x64x256xbf16, #tpu.memory_space<vmem>>, %arg2: memref<16x64xbf16, #tpu.memory_space<vmem>>, %arg3: memref<64x64xbf16, #tpu.memory_space<vmem>>, %arg4: memref<1x8x256xbf16, #tpu.memory_space<vmem>>, %arg5: memref<1x8x256xbf16, #tpu.memory_space<vmem>>, %arg6: memref<1x72x256xbf16, #tpu.memory_space<vmem>>) attributes {dimension_semantics = [#tpu.dimension_semantics<parallel>], iteration_bounds = array<i64: 2>, scalar_prefetch = 0 : i64, scratch_operands = 0 : i64, tpu.core_type = #tpu.core_type<tc>, window_params = [{transform_indices = @transform_0, window_bounds = array<i64: 1, 64, 256>}, {pipeline_mode = #tpu.pipeline_mode<synchronous>, transform_indices = @transform_1, window_bounds = array<i64: 16, 64>}, {pipeline_mode = #tpu.pipeline_mode<synchronous>, transform_indices = @transform_2, window_bounds = array<i64: 64, 64>}, {transform_indices = @transform_3, window_bounds = array<i64: 1, 8, 256>}, {transform_indices = @transform_4, window_bounds = array<i64: 1, 8, 256>}, {transform_indices = @transform_5, window_bounds = array<i64: 1, 72, 256>}]} {
    %c0 = arith.constant 0 : index
    %c0_0 = arith.constant 0 : index
    %c0_1 = arith.constant 0 : index
    %0 = vector.load %arg1[%c0, %c0_0, %c0_1] : memref<1x64x256xbf16, #tpu.memory_space<vmem>>, vector<1x64x256xbf16>
    %1 = vector.shape_cast %0 : vector<1x64x256xbf16> to vector<64x256xbf16>
    %c0_2 = arith.constant 0 : index
    %c0_3 = arith.constant 0 : index
    %2 = vector.load %arg2[%c0_2, %c0_3] : memref<16x64xbf16, #tpu.memory_space<vmem>>, vector<16x64xbf16>
    %cst = arith.constant dense<0.000000e+00> : vector<16x256xf32>
    %3 = tpu.matmul %2, %1, %cst {dimension_numbers = #tpu.dot_dimension_numbers<[1], [0], [0], [1], [0, 0, 1, 1], [], []>} : vector<16x64xbf16>, vector<64x256xbf16>, vector<16x256xf32> -> vector<16x256xf32>
    %4 = vector.extract_strided_slice %3 {offsets = [0, 0], sizes = [8, 256], strides = [1, 1]} : vector<16x256xf32> to vector<8x256xf32>
    %5 = arith.truncf %4 : vector<8x256xf32> to vector<8x256xbf16>
    %c0_4 = arith.constant 0 : index
    %c0_5 = arith.constant 0 : index
    %c0_6 = arith.constant 0 : index
    %6 = vector.load %arg4[%c0_4, %c0_5, %c0_6] : memref<1x8x256xbf16, #tpu.memory_space<vmem>>, vector<1x8x256xbf16>
    %7 = vector.shape_cast %6 : vector<1x8x256xbf16> to vector<8x256xbf16>
    %8 = vector.shape_cast %5 : vector<8x256xbf16> to vector<1x8x256xbf16>
    tpu.vector_store %arg4[%c0_4, %c0_5, %c0_6], %8 {strides = array<i32>} : memref<1x8x256xbf16, #tpu.memory_space<vmem>>, vector<1x8x256xbf16>,
    %9 = vector.extract_strided_slice %3 {offsets = [8, 0], sizes = [8, 256], strides = [1, 1]} : vector<16x256xf32> to vector<8x256xf32>
    %10 = arith.truncf %9 : vector<8x256xf32> to vector<8x256xbf16>
    %c0_7 = arith.constant 0 : index
    %c0_8 = arith.constant 0 : index
    %c0_9 = arith.constant 0 : index
    %11 = vector.load %arg5[%c0_7, %c0_8, %c0_9] : memref<1x8x256xbf16, #tpu.memory_space<vmem>>, vector<1x8x256xbf16>
    %12 = vector.shape_cast %11 : vector<1x8x256xbf16> to vector<8x256xbf16>
    %13 = vector.shape_cast %10 : vector<8x256xbf16> to vector<1x8x256xbf16>
    tpu.vector_store %arg5[%c0_7, %c0_8, %c0_9], %13 {strides = array<i32>} : memref<1x8x256xbf16, #tpu.memory_space<vmem>>, vector<1x8x256xbf16>,
    %c0_10 = arith.constant 0 : index
    %c0_11 = arith.constant 0 : index
    %14 = vector.load %arg3[%c0_10, %c0_11] : memref<64x64xbf16, #tpu.memory_space<vmem>>, vector<64x64xbf16>
    %cst_12 = arith.constant dense<0.000000e+00> : vector<64x256xf32>
    %15 = tpu.matmul %14, %1, %cst_12 {dimension_numbers = #tpu.dot_dimension_numbers<[1], [0], [0], [1], [0, 0, 1, 1], [], []>} : vector<64x64xbf16>, vector<64x256xbf16>, vector<64x256xf32> -> vector<64x256xf32>
    %16 = arith.truncf %15 : vector<64x256xf32> to vector<64x256xbf16>
    %c0_13 = arith.constant 0 : index
    %c0_14 = arith.constant 0 : index
    %c0_15 = arith.constant 0 : index
    %17 = vector.load %arg6[%c0_13, %c0_14, %c0_15] : memref<1x72x256xbf16, #tpu.memory_space<vmem>>, vector<1x64x256xbf16>
    %18 = vector.shape_cast %17 : vector<1x64x256xbf16> to vector<64x256xbf16>
    %19 = vector.shape_cast %16 : vector<64x256xbf16> to vector<1x64x256xbf16>
    tpu.vector_store %arg6[%c0_13, %c0_14, %c0_15], %19 {strides = array<i32>} : memref<1x72x256xbf16, #tpu.memory_space<vmem>>, vector<1x64x256xbf16>,
    %20 = tpu.iota {dimensions = array<i32: 0>} : vector<8x256xi32>
    %c0_i32 = arith.constant 0 : i32
    %21 = vector.broadcast %c0_i32 : i32 to vector<8x256xi32>
    %22 = arith.cmpi eq, %20, %21 : vector<8x256xi32>
    %23 = arith.extui %22 : vector<8x256xi1> to vector<8x256xi32>
    %24 = arith.sitofp %23 : vector<8x256xi32> to vector<8x256xf32>
    %25 = arith.truncf %24 : vector<8x256xf32> to vector<8x256xbf16>
    %c0_16 = arith.constant 0 : index
    %c64 = arith.constant 64 : index
    %c0_17 = arith.constant 0 : index
    %26 = vector.load %arg6[%c0_16, %c64, %c0_17] : memref<1x72x256xbf16, #tpu.memory_space<vmem>>, vector<1x8x256xbf16>
    %27 = vector.shape_cast %26 : vector<1x8x256xbf16> to vector<8x256xbf16>
    %28 = vector.shape_cast %25 : vector<8x256xbf16> to vector<1x8x256xbf16>
    tpu.vector_store %arg6[%c0_16, %c64, %c0_17], %28 {strides = array<i32>} : memref<1x72x256xbf16, #tpu.memory_space<vmem>>, vector<1x8x256xbf16>,
    return
  }
  func.func @transform_0(%arg0: i32) -> (i32, i32, i32) {
    %c0_i32 = arith.constant 0 : i32
    %c0_i32_0 = arith.constant 0 : i32
    %c0_i32_1 = arith.constant 0 : i32
    return %arg0, %c0_i32, %c0_i32_0 : i32, i32, i32
  }
  func.func @transform_1(%arg0: i32) -> (i32, i32) {
    %c0_i32 = arith.constant 0 : i32
    %c0_i32_0 = arith.constant 0 : i32
    %c0_i32_1 = arith.constant 0 : i32
    return %c0_i32, %c0_i32_0 : i32, i32
  }
  func.func @transform_2(%arg0: i32) -> (i32, i32) {
    %c0_i32 = arith.constant 0 : i32
    %c0_i32_0 = arith.constant 0 : i32
    %c0_i32_1 = arith.constant 0 : i32
    return %c0_i32, %c0_i32_0 : i32, i32
  }
  func.func @transform_3(%arg0: i32) -> (i32, i32, i32) {
    %c0_i32 = arith.constant 0 : i32
    %c0_i32_0 = arith.constant 0 : i32
    %c0_i32_1 = arith.constant 0 : i32
    return %arg0, %c0_i32, %c0_i32_0 : i32, i32, i32
  }
  func.func @transform_4(%arg0: i32) -> (i32, i32, i32) {
    %c0_i32 = arith.constant 0 : i32
    %c0_i32_0 = arith.constant 0 : i32
    %c0_i32_1 = arith.constant 0 : i32
    return %arg0, %c0_i32, %c0_i32_0 : i32, i32, i32
  }
  func.func @transform_5(%arg0: i32) -> (i32, i32, i32) {
    %c0_i32 = arith.constant 0 : i32
    %c0_i32_0 = arith.constant 0 : i32
    %c0_i32_1 = arith.constant 0 : i32
    return %arg0, %c0_i32, %c0_i32_0 : i32, i32, i32
  }
}

</mosaic_0001>

<bundles_post_ra>
// kernel: tpu_custom_call.1
= control target key start
LH: loop header
LB: loop body
LE: loop exit
PB: predicated region body
PF: predicated region fallthrough
CT: control target
= control target key end

     0   :  { %11 = vsyncpa [#allocation3], 0  ;;  %s1511_s0 = inlined_call_operand.hbm [shape: bf16[2,64,256], index: 0, kind: input, shape index: {}]   ;;  %s1512_s1 = inlined_call_operand.hbm [shape: bf16[16,64], index: 1, kind: input, shape index: {}]   ;;  %s1513_s2 = inlined_call_operand.hbm [shape: bf16[64,64], index: 2, kind: input, shape index: {}]   ;;  %s1514_s3 = inlined_call_operand.hbm [shape: bf16[2,8,256], index: 3, kind: output, shape index: {0}]   ;;  %s1515_s4 = inlined_call_operand.hbm [shape: bf16[2,8,256], index: 4, kind: output, shape index: {1}]   ;;  %s1516_s5 = inlined_call_operand.hbm [shape: bf16[2,72,256], index: 5, kind: output, shape index: {2}]  }
   0x1   :  { %13 = vsyncpa [#allocation3 + $0x1], 0 }
   0x2   :  { %14 = vsyncpa [#allocation6], 0 }
   0x3   :  { %15 = vsyncpa [#allocation4], 0 }
   0x4   :  { %17 = vsyncpa [#allocation4 + $0x1], 0 }
   0x5   :  { %18 = vsyncpa [#allocation10], 0 }
   0x6   :  { %20 = vsyncpa [#allocation10 + $0x1], 0  ;;  %s1230_s18 = smov 0   ;;  %s1232_s19 = smov 0  }
   0x7   :  { %s1234_s20 = smov 0   ;;  %s1236_s21 = smov 0  }
   0x8 LB: > { %s1251_s22 = sadd.s32 4294967295, %s1183_s21   ;;  %s1521_s23 = sadd.s32 4294967294, %s1183_s21   ;;  %s1183_s21 = sphi %s1236_s21, %s1541_s21   ;;  %s1179_s20 = sphi %s1234_s20, %s1540_s20   ;;  %s1175_s19 = sphi %s1232_s19, %s1539_s19   ;;  %s1171_s18 = sphi %s1230_s18, %s1538_s18  }
   0x9   : > { %p46_p0 = scmp.ne.s32.totalorder %s1175_s19, %s1171_s18  ;;  %p1517_p1 = scmp.eq.s32.totalorder %s1251_s22, 0 }
   0xa   : > { %p118_p3 = scmp.eq.s32.totalorder %s1521_s23, 1  ;;  %p802_p5 = scmp.ge.s32.totalorder %s1183_s21, 1 }
   0xb   : > { %p1262_p4 = por %p1517_p1, %p46_p0  ;;  %p177_p7 = scmp.lt.s32.totalorder %s1183_s21, 3 }
   0xc   : > { %p1267_p6 = por %p118_p3, %p46_p0  ;;  %s1185_s27 = smov [#allocation5]  }
   0xd   : > { %s1522_s24 = scalar_select %p1262_p4, 1, 0 }
   0xe   : > { %s1523_s25 = scalar_select %p1267_p6, 1, 0 }
   0xf   : > { %p1272_p8 = pnand %p802_p5, %p177_p7  ;;  %s189_s28 = sshll.u32 %s1185_s27, 4  ;;  %s190_s28 = int_to_ptr.vmem [resolvable:$true] %s189_s28 }
  0x10   : > { %s1186_s30 = smov [#allocation7]   ;;  %s990_s7 = scalar_lea.vmem %s190_s28, 128 }
  0x11   : > { %s1524_s26 = scalar_select %p1272_p8, 1, 0 }
  0x12   : > { %p892_p9 = pneg %p1272_p8  ;;  %s202_s6 = sshll.u32 %s1186_s30, 4  ;;  %s203_s6 = int_to_ptr.vmem [resolvable:$true] %s202_s6 }
  0x13   : > { %p991_p13 = scmp.ne.s32.totalorder %s190_s28, %s990_s7  ;;  %p998_p5 = scmp.lt.s32.totalorder %s190_s28, %s190_s28 }
  0x14   : > { %p1281_p11 = pnand %p892_p9, %p1517_p1  ;;  %p999_p7 = scmp.lt.s32.totalorder %s990_s7, %s990_s7 }
  0x16   : > { %p981_p12 = pneg %p1281_p11  ;;  %p1000_p10 = por %p999_p7, %p998_p5 }
  0x18   : > { %p993_p0 = pnand %p991_p13, %p981_p12 }
  0x1a   : > { %p994_p3 = pneg %p993_p0 }
  0x1c   : > { %p1001_p9 = pnand %p1000_p10, %p994_p3 }
  0x1e   : > { %1004 = shalt.err (!%p1001_p9)
}
  0x1f   : > { %s1187_s8 = smov 64   ;;  %s1188_s9 = smov 4  }
  0x20   : > { %895 = dma.hbm_to_vmem [thread:$0]  (!%p1281_p11), %s1512_s1, 128, %s190_s28, [#allocation6], %s1187_s8, %s1187_s8, %s1188_s9  }
  0x21   : > { %s1016_s12 = scalar_lea.vmem %s203_s6, 512  ;;  %p1024_p2 = scmp.lt.s32.totalorder %s203_s6, %s203_s6 }
  0x22   : > { %p1017_p1 = scmp.ne.s32.totalorder %s203_s6, %s1016_s12  ;;  %p1025_p6 = scmp.lt.s32.totalorder %s1016_s12, %s1016_s12 }
  0x24   : > { %p1019_p13 = pnand %p1017_p1, %p981_p12  ;;  %p1026_p5 = por %p1025_p6, %p1024_p2 }
  0x26   : > { %p1020_p0 = pneg %p1019_p13 }
  0x28   : > { %p1027_p10 = pnand %p1026_p5, %p1020_p0 }
  0x2a   : > { %1030 = shalt.err (!%p1027_p10)
}
  0x2b   : > { %898 = dma.hbm_to_vmem [thread:$0]  (!%p1281_p11), %s1513_s2, 512, %s203_s6, [#allocation6], %s1187_s8, %s1187_s8, %s1188_s9  }
  0x2c   : > { %s1304_s15 = sadd.s32 1, %s1183_s21   ;;  %s33_s16 = sadd.s32 1, %s1179_s20 }
  0x2d   : > { %s30_s17 = ssub.s32 %s1183_s21, %s1304_s15  ;;  %p40_p1 = scmp.ne.s32.totalorder %s1179_s20, %s1175_s19 }
  0x2e   : > { %p31_p2 = scmp.eq.s32.totalorder %s30_s17, 0  ;;  %p41_p6 = scmp.eq.s32.totalorder %s1183_s21, 0 }
  0x2f   : > { %p1526_p12 = scmp.eq.s32.totalorder %s1251_s22, 1  ;;  %p915_p7 = scmp.lt.s32.totalorder %s1183_s21, 2 }
  0x30   : > { %s1320_s28 = scalar_select %p31_p2, %s1179_s20, %s33_s16  }
  0x31   : > { %p1314_p3 = por %p1526_p12, %p40_p1  ;;  %p42_p9 = por %p41_p6, %p40_p1 }
  0x32   : > { %s216_s29 = sand.u32 1, %s1179_s20   ;;  %s853_s6 = sshll.u32 %s1183_s21, 10 }
  0x33   : > { %s1527_s27 = scalar_select %p1314_p3, 1, 0 }
  0x34   : > { %s806_s30 = sshll.u32 %s216_s29, 6  ;;  %s1327_s9 = scalar_lea.hbm %s1511_s0, %s853_s6 }
  0x35   : > { %s220_s10 = scalar_lea.vmem [#allocation2], %s806_s30  ;;  %p1331_p11 = pnand %p915_p7, %p42_p9 }
  0x36   : > { %s227_s11 = sshll.u32 %s220_s10, 4  ;;  %s1335_s13 = scalar_lea.sflag [#allocation3], %s216_s29  ;;  %s1329_s11 = int_to_ptr.vmem [resolvable:$true] %s227_s11 }
  0x37   : > { %s1031_s14 = scalar_lea.hbm %s1327_s9, 1024  ;;  %p1033_p0 = pneg %p1331_p11 }
  0x38   : > { %p1032_p13 = scmp.ne.s32.totalorder %s1327_s9, %s1031_s14  ;;  %s1036_s30 = scalar_lea.hbm %s1511_s0, 2048 }
  0x39   : > { %p1037_p1 = scmp.lt.s32.totalorder %s1327_s9, %s1511_s0  ;;  %p1038_p2 = scmp.lt.s32.totalorder %s1036_s30, %s1031_s14 }
  0x3a   : > { %p1034_p5 = pnand %p1033_p0, %p1032_p13 }
  0x3b   : > { %p1039_p6 = por %p1038_p2, %p1037_p1 }
  0x3c   : > { %p1035_p10 = pneg %p1034_p5 }
  0x3e   : > { %p1040_p12 = pnand %p1039_p6, %p1035_p10 }
  0x40   : > { %1043 = shalt.err (!%p1040_p12)
}
  0x41   : > { %s1044_s29 = scalar_lea.vmem %s1329_s11, 1024  ;;  %s1189_s8 = smov [#allocation2]  }
  0x42   : > { %p1045_p7 = scmp.ne.s32.totalorder %s1329_s11, %s1044_s29  ;;  %s1049_s10 = sshll.u32 %s1189_s8, 4  ;;  %s1050_s10 = int_to_ptr.vmem [resolvable:$false] %s1049_s10 }
  0x43   : > { %s1051_s16 = scalar_lea.vmem %s1050_s10, 2048  ;;  %p1052_p5 = scmp.lt.s32.totalorder %s1329_s11, %s1050_s10 }
  0x44   : > { %p1047_p9 = pnand %p1045_p7, %p1033_p0  ;;  %p1053_p3 = scmp.lt.s32.totalorder %s1051_s16, %s1044_s29 }
  0x46   : > { %p1048_p13 = pneg %p1047_p9  ;;  %p1054_p4 = por %p1053_p3, %p1052_p5 }
  0x48   : > { %p1055_p8 = pnand %p1054_p4, %p1048_p13 }
  0x4a   : > { %1058 = shalt.err (!%p1055_p8)
}
  0x4b   : > { %s1190_s14 = smov 128   ;;  %s1191_s17 = smov 8  }
  0x4c   : > { %902 = dma.hbm_to_vmem [thread:$0]  (!%p1331_p11), %s1327_s9, 1024, %s1329_s11, %s1335_s13, %s1190_s14, %s1190_s14, %s1191_s17  }
  0x4d   : > { %p1529_p0 = scmp.ne.s32.totalorder %s1524_s26, 0 }
  0x4e   : > { %s1359_s30 = sand.u32 (!%p1529_p0), 1, %s1175_s19   ;;  %p1530_p4 = scmp.ne.s32.totalorder (!%p1529_p0), %s1522_s24, 0 }
  0x4f   : > { %239 = sbr.rel (%p1529_p0) target bundleno = 366 (0x16e), region = 32  ;;  %s810_s6 = sshll.u32 (!%p1529_p0), %s1359_s30, 6 }
  0x50   : > { %s242_s7 = scalar_lea.sflag (!%p1529_p0), [#allocation3], %s1359_s30  ;;  %s245_s29 = scalar_lea.vmem (!%p1529_p0), [#allocation2], %s810_s6 }
  0x54   : > { %1154 = dma.done.wait (%p1530_p4), %s242_s7, 1024  }
  0x55   : > { %1156 = vsyncadd (%p1530_p4), %s242_s7, 4294966272  ;;  %p1531_p8 = scmp.eq.s32.totalorder %s1251_s22, 0 }
  0x57   : > { %1158 = dma.done.wait (%p1531_p8), [#allocation6], 640   ;;  %p1532_p3 = pmov %p1531_p8 }
  0x58   : > { %v1192_v0 = vmov 0   ;;  %v962_v1 = vld [vmem:[%s245_s29 + $0x34] ss:$8 sps:$4 sm:$0xff]   ;;  %v964_v2 = vld [vmem:[%s245_s29 + $0x30] ss:$8 sps:$4 sm:$0xff]   ;;  %v974_v9 = vld [vmem:[#allocation5] sm:$0xff]   ;;  %v580_v14 = vlaneseq }
  0x59   : > { %1160 = vsyncadd (%p1532_p3), [#allocation6], 4294966656  ;;  %382 = vmatprep.mubr.bf16.mxu0 %v1192_v0  ;;  %493 = vmatprep.mubr.bf16.mxu1 %v1192_v0  ;;  %v965_v3 = vld [vmem:[%s245_s29 + $0x24] ss:$8 sps:$4 sm:$0xff]   ;;  %v967_v4 = vld [vmem:[%s245_s29 + $0x20] ss:$8 sps:$4 sm:$0xff]  }
  0x5a   : > { %358 = vmatprep.subr.bf16.mxu0 %v962_v1  ;;  %866 = vmatprep.subr.bf16.mxu1 %v962_v1  ;;  %v968_v5 = vld [vmem:[%s245_s29 + $0x14] ss:$8 sps:$4 sm:$0xff]   ;;  %v970_v6 = vld [vmem:[%s245_s29 + $0x10] ss:$8 sps:$4 sm:$0xff]   ;;  %v971_v7 = vld [vmem:[%s245_s29 + $0x4] ss:$8 sps:$4 sm:$0xff]  }
  0x5b   : > { %359 = vmatpush1.bf16.msra.mxu0 %v964_v2  ;;  %870 = vmatpush1.bf16.msra.mxu1 %v964_v2  ;;  %v973_v8 = vld [vmem:[%s245_s29] ss:$8 sps:$4 sm:$0xff]   ;;  %v975_v10 = vld [vmem:[#allocation7 + $0x8] sm:$0xff]   ;;  %vm346_vm0 = vcmask 523264   ;;  %v976_v11 = vld [vmem:[#allocation7 + $0x10] sm:$0xff]   ;;  %v581_v17 = vshrl.u32 %v580_v14, 7 }
  0x5c   : > { %360 = vmatprep.subr.bf16.mxu0 %v965_v3  ;;  %867 = vmatprep.subr.bf16.mxu1 %v965_v3  ;;  %v977_v12 = vld [vmem:[#allocation7] sm:$0xff]   ;;  %v978_v13 = vld [vmem:[#allocation7 + $0x18] sm:$0xff]   ;;  %v1193_v15 = vmov 839922192   ;;  %s874_s24 = smul.u32 72, %s1359_s30  ;;  %v1194_v19 = vmov 0.0  }
  0x5d   : > { %v588_v16 = vunpack.c.l.s4 %v1193_v15  ;;  %vm582_vm1 = vcmp.eq.s32.totalorder %v581_v17, 0  ;;  %s813_s9 = sshll.u32 %s1359_s30, 3  ;;  %s864_s11 = sshll.u32 %s1251_s22, 7 }
  0x5e   : > { %v843_v20 = vsel %vm582_vm1, 1.0, %v1194_v19  ;;  %s1377_s26 = scalar_lea.vmem [#allocation11], %s874_s24  ;;  %s275_s12 = scalar_lea.vmem [#allocation8], %s813_s9 }
  0x5f   : > { %361 = vmatpush1.bf16.msra.mxu0 %v967_v4  ;;  %871 = vmatpush1.bf16.msra.mxu1 %v967_v4  ;;  %v589_v18 = vunpack.c.0.s8 %v588_v16  ;;  %v585_v22 = vpack.c.bf16 %v843_v20, %v843_v20  ;;  %s621_s13 = sshll.u32 %s275_s12, 4  ;;  %s1388_s14 = scalar_lea.hbm %s1514_s3, %s864_s11  ;;  %s1390_s13 = int_to_ptr.vmem [resolvable:$true] %s621_s13 }
  0x60   : > { %362 = vmatprep.subr.bf16.mxu0 %v968_v5  ;;  %868 = vmatprep.subr.bf16.mxu1 %v968_v5  ;;  %s1392_s17 = scalar_lea.vmem [#allocation9], %s813_s9  ;;  %s597_s7 = scalar_lea.sflag [#allocation4], %s1359_s30 }
  0x61   : > { %v592_v21 = vsub.s32 %v589_v18, %v581_v17  ;;  %s635_s6 = sshll.u32 %s1392_s17, 4  ;;  %s1059_s29 = scalar_lea.vmem %s1390_s13, 128  ;;  %s1426_s6 = int_to_ptr.vmem [resolvable:$true] %s635_s6 }
  0x62   : > { %p1060_p11 = scmp.ne.s32.totalorder %s1390_s13, %s1059_s29  ;;  %p1533_p10 = scmp.ne.s32.totalorder %s1527_s27, 0 }
  0x63   : > { %363 = vmatpush1.bf16.msra.mxu0 %v970_v6  ;;  %872 = vmatpush1.bf16.msra.mxu1 %v970_v6  ;;  %v593_v23 = vrot.slane %v585_v22, %v592_v21  ;;  %s1195_s24 = smov [#allocation8]  }
  0x64   : > { %364 = vmatprep.subr.bf16.mxu0 %v971_v7  ;;  %869 = vmatprep.subr.bf16.mxu1 %v971_v7  ;;  %p1061_p1 = pnand %p1060_p11, %p1533_p10  ;;  %s1063_s10 = sshll.u32 %s1195_s24, 4  ;;  %s1064_s10 = int_to_ptr.vmem [resolvable:$false] %s1063_s10 }
  0x65   : > { %595 = vst [vmem:[%s1377_s26 + $0x40] sm:$0xff] %v593_v23  ;;  %s1065_s16 = scalar_lea.vmem %s1064_s10, 256  ;;  %p1066_p6 = scmp.lt.s32.totalorder %s1390_s13, %s1064_s10 }
  0x66   : > { %p1062_p2 = pneg %p1061_p1  ;;  %p1067_p12 = scmp.lt.s32.totalorder %s1065_s16, %s1059_s29 }
  0x67   : > { %365 = vmatpush1.bf16.msra.mxu0 %v973_v8  ;;  %873 = vmatpush1.bf16.msra.mxu1 %v973_v8 }
  0x68   : > { %459 = vmatprep.subr.bf16.mxu0 %v962_v1  ;;  %p1068_p7 = por %p1067_p12, %p1066_p6 }
  0x6a   : > { %824 = vmatmul.mubr.msk.bf16.vlgmr.msra.gmra.mxu0 %vm346_vm0, %v974_v9  ;;  %832 = vmatmul.mubr.msk.bf16.vlgmr.msra.gmra.mxu1 %vm346_vm0, %v975_v10  ;;  %p1069_p9 = pnand %p1068_p7, %p1062_p2 }
  0x6b   : > { %460 = vmatpush1.bf16.msra.mxu0 %v964_v2  ;;  %503 = vmatprep.mubr.bf16.mxu1 %v1192_v0 }
  0x6c   : > { %461 = vmatprep.subr.bf16.mxu0 %v965_v3  ;;  %483 = vmatprep.mubr.bf16.mxu0 %v1192_v0 }
  0x6f   : > { %462 = vmatpush1.bf16.msra.mxu0 %v967_v4 }
  0x70   : > { %463 = vmatprep.subr.bf16.mxu0 %v968_v5 }
  0x72   : > { %833 = vmatmul.mubr.msk.bf16.gmra.mxu1 %vm346_vm0, %v976_v11 }
  0x73   : > { %464 = vmatpush1.bf16.msra.mxu0 %v970_v6  ;;  %513 = vmatprep.mubr.bf16.mxu1 %v1192_v0 }
  0x74   : > { %465 = vmatprep.subr.bf16.mxu0 %v971_v7 }
  0x77   : > { %466 = vmatpush1.bf16.msra.mxu0 %v973_v8 }
  0x7a   : > { %831 = vmatmul.mubr.msk.bf16.vlgmr.msra.gmra.mxu0 %vm346_vm0, %v977_v12  ;;  %834 = vmatmul.mubr.msk.bf16.gmra.mxu1 %vm346_vm0, %v978_v13 }
 0x12a   : > { %v384_v24 = vpop.f32.mrf.mxu0  ;;  %v495_v25 = vpop.f32.mrf.mxu1 }
 0x12c   : > { %v386_v26 = vpop.f32.mrf.mxu0  ;;  %v497_v27 = vpop.f32.mrf.mxu1 }
 0x12d   : > { %v854_v28 = vpack.c.bf16 %v386_v26, %v384_v24  ;;  %v858_v29 = vpack.c.bf16 %v497_v27, %v495_v25 }
 0x12e   : > { %v388_v30 = vpop.f32.mrf.mxu0  ;;  %v499_v31 = vpop.f32.mrf.mxu1 }
 0x12f   : > { %401 = vst [vmem:[%s275_s12] sm:$0xff] %v854_v28  ;;  %574 = vst [vmem:[%s1377_s26 + $0x10] sm:$0xff] %v858_v29 }
 0x130   : > { %v390_v32 = vpop.f32.mrf.mxu0  ;;  %v501_v33 = vpop.f32.mrf.mxu1 }
 0x131   : > { %1072 = shalt.err (!%p1069_p9)
}
 0x132   : > { %s1073_s9 = scalar_lea.hbm %s1388_s14, 128  ;;  %s1077_s24 = scalar_lea.hbm %s1514_s3, 256 }
 0x133   : > { %p1074_p13 = scmp.ne.s32.totalorder %s1388_s14, %s1073_s9  ;;  %p1078_p4 = scmp.lt.s32.totalorder %s1388_s14, %s1514_s3 }
 0x134   : > { %p1079_p8 = scmp.lt.s32.totalorder %s1077_s24, %s1073_s9 }
 0x135   : > { %p1075_p5 = pnand %p1074_p13, %p1533_p10 }
 0x136   : > { %p1080_p3 = por %p1079_p8, %p1078_p4 }
 0x137   : > { %p1076_p0 = pneg %p1075_p5 }
 0x139   : > { %p1081_p11 = pnand %p1080_p3, %p1076_p0 }
 0x13b   : > { %1084 = shalt.err (!%p1081_p11)
}
 0x13c   : > { %886 = dma.vmem_to_hbm [thread:$0]  (%p1533_p10), %s1390_s13, 128, %s1388_s14, %s597_s7   ;;  %v855_v34 = vpack.c.bf16 %v390_v32, %v388_v30  ;;  %v859_v35 = vpack.c.bf16 %v501_v33, %v499_v31  ;;  %v505_v36 = vpop.f32.mrf.mxu1 }
 0x13d   : > { %s1422_s29 = scalar_lea.hbm %s1515_s4, %s864_s11  ;;  %s1534_s10 = sand.u32 1, %s1251_s22  }
 0x13e   : > { %410 = vst [vmem:[%s1392_s17] sm:$0xff] %v855_v34  ;;  %575 = vst [vmem:[%s1377_s26 + $0x18] sm:$0xff] %v859_v35  ;;  %v507_v37 = vpop.f32.mrf.mxu1  ;;  %s1432_s13 = scalar_lea.sflag [#allocation10], %s1534_s10  ;;  %s1085_s14 = scalar_lea.vmem %s1426_s6, 128 }
 0x13f   : > { %p1086_p1 = scmp.ne.s32.totalorder %s1426_s6, %s1085_s14  ;;  %s1196_s11 = smov [#allocation9]  }
 0x140   : > { %s1089_s7 = sshll.u32 %s1196_s11, 4  ;;  %s1090_s7 = int_to_ptr.vmem [resolvable:$false] %s1089_s7 }
 0x141   : > { %p1087_p2 = pnand %p1086_p1, %p1533_p10  ;;  %s1091_s16 = scalar_lea.vmem %s1090_s7, 256 }
 0x142   : > { %p1092_p12 = scmp.lt.s32.totalorder %s1426_s6, %s1090_s7  ;;  %p1093_p7 = scmp.lt.s32.totalorder %s1091_s16, %s1085_s14 }
 0x143   : > { %p1088_p6 = pneg %p1087_p2 }
 0x144   : > { %p1094_p9 = por %p1093_p7, %p1092_p12 }
 0x146   : > { %p1095_p13 = pnand %p1094_p9, %p1088_p6 }
 0x148   : > { %1098 = shalt.err (!%p1095_p13)
}
 0x149   : > { %s1099_s17 = scalar_lea.hbm %s1422_s29, 128  ;;  %s1103_s12 = scalar_lea.hbm %s1515_s4, 256 }
 0x14a   : > { %p1100_p5 = scmp.ne.s32.totalorder %s1422_s29, %s1099_s17  ;;  %p1104_p8 = scmp.lt.s32.totalorder %s1422_s29, %s1515_s4 }
 0x14b   : > { %p1105_p3 = scmp.lt.s32.totalorder %s1103_s12, %s1099_s17 }
 0x14c   : > { %p1101_p0 = pnand %p1100_p5, %p1533_p10 }
 0x14d   : > { %p1106_p11 = por %p1105_p3, %p1104_p8 }
 0x14e   : > { %p1102_p4 = pneg %p1101_p0 }
 0x150   : > { %p1107_p1 = pnand %p1106_p11, %p1102_p4 }
 0x152   : > { %1110 = shalt.err (!%p1107_p1)
}
 0x153   : > { %887 = dma.vmem_to_hbm [thread:$0]  (%p1533_p10), %s1426_s6, 128, %s1422_s29, %s1432_s13   ;;  %v860_v38 = vpack.c.bf16 %v507_v37, %v505_v36  ;;  %v509_v39 = vpop.f32.mrf.mxu1  ;;  %v485_v42 = vpop.f32.mrf.mxu0 }
 0x154   : > { %s648_s8 = sshll.u32 %s1377_s26, 4  ;;  %s875_s10 = smul.u32 1152, %s1251_s22  ;;  %s1461_s8 = int_to_ptr.vmem [resolvable:$true] %s648_s8 }
 0x155   : > { %576 = vst [vmem:[%s1377_s26 + $0x20] sm:$0xff] %v860_v38  ;;  %v511_v40 = vpop.f32.mrf.mxu1  ;;  %v487_v44 = vpop.f32.mrf.mxu0  ;;  %s1111_s22 = scalar_lea.vmem %s1461_s8, 1152  ;;  %s1197_s11 = smov [#allocation11]  }
 0x156   : > { %v861_v41 = vpack.c.bf16 %v511_v40, %v509_v39  ;;  %v856_v46 = vpack.c.bf16 %v487_v44, %v485_v42  ;;  %s1466_s14 = scalar_lea.hbm %s1516_s5, %s875_s10  ;;  %p1112_p2 = scmp.ne.s32.totalorder %s1461_s8, %s1111_s22 }
 0x157   : > { %v515_v43 = vpop.f32.mrf.mxu1  ;;  %v489_v48 = vpop.f32.mrf.mxu0  ;;  %s1115_s7 = sshll.u32 %s1197_s11, 4  ;;  %s1116_s7 = int_to_ptr.vmem [resolvable:$false] %s1115_s7 }
 0x158   : > { %577 = vst [vmem:[%s1377_s26 + $0x28] sm:$0xff] %v861_v41  ;;  %572 = vst [vmem:[%s1377_s26] sm:$0xff] %v856_v46  ;;  %p1113_p6 = pnand %p1112_p2, %p1533_p10  ;;  %s1117_s16 = scalar_lea.vmem %s1116_s7, 2304 }
 0x159   : > { %v517_v45 = vpop.f32.mrf.mxu1  ;;  %v491_v50 = vpop.f32.mrf.mxu0  ;;  %p1118_p7 = scmp.lt.s32.totalorder %s1461_s8, %s1116_s7  ;;  %p1119_p9 = scmp.lt.s32.totalorder %s1117_s16, %s1111_s22 }
 0x15a   : > { %v862_v47 = vpack.c.bf16 %v517_v45, %v515_v43  ;;  %v857_v52 = vpack.c.bf16 %v491_v50, %v489_v48  ;;  %p1114_p12 = pneg %p1113_p6 }
 0x15b   : > { %v519_v49 = vpop.f32.mrf.mxu1  ;;  %p1120_p13 = por %p1119_p9, %p1118_p7 }
 0x15c   : > { %578 = vst [vmem:[%s1377_s26 + $0x30] sm:$0xff] %v862_v47  ;;  %573 = vst [vmem:[%s1377_s26 + $0x8] sm:$0xff] %v857_v52 }
 0x15d   : > { %v521_v51 = vpop.f32.mrf.mxu1  ;;  %p1121_p5 = pnand %p1120_p13, %p1114_p12 }
 0x15e   : > { %v863_v53 = vpack.c.bf16 %v521_v51, %v519_v49 }
 0x160   : > { %579 = vst [vmem:[%s1377_s26 + $0x38] sm:$0xff] %v863_v53 }
 0x161   : > { %1124 = shalt.err (!%p1121_p5)
}
 0x162   : > { %s1125_s17 = scalar_lea.hbm %s1466_s14, 1152  ;;  %s1129_s30 = scalar_lea.hbm %s1516_s5, 2304 }
 0x163   : > { %p1126_p0 = scmp.ne.s32.totalorder %s1466_s14, %s1125_s17  ;;  %p1130_p3 = scmp.lt.s32.totalorder %s1466_s14, %s1516_s5 }
 0x164   : > { %p1131_p11 = scmp.lt.s32.totalorder %s1129_s30, %s1125_s17 }
 0x165   : > { %p1127_p4 = pnand %p1126_p0, %p1533_p10 }
 0x166   : > { %p1132_p1 = por %p1131_p11, %p1130_p3 }
 0x167   : > { %p1128_p8 = pneg %p1127_p4 }
 0x169   : > { %p1133_p2 = pnand %p1132_p1, %p1128_p8 }
 0x16b   : > { %1136 = shalt.err (!%p1133_p2)
}
 0x16c   : > { %s1198_s23 = smov 128   ;;  %s1199_s10 = smov 8  }
 0x16d   : > { %888 = dma.vmem_to_hbm [thread:$0]  (%p1533_p10), %s1461_s8, 1152, %s1466_s14, %s1432_s13, %s1198_s23, %s1198_s23, %s1199_s10  }
 0x16e PF: > { %s663_s6 = sand.u32 1, %s1171_s18   ;;  %p1535_p6 = scmp.ne.s32.totalorder %s1523_s25, 0 }
 0x16f   : > { %p1536_p12 = scmp.ge.s32.totalorder %s1183_s21, 2  ;;  %s664_s29 = scalar_lea.sflag [#allocation4], %s663_s6 }
 0x171   : > { %p904_p7 = pnand %p1536_p12, %p1535_p6 }
 0x173   : > { %p905_p9 = pneg %p904_p7 }
 0x175   : > { %1162 = dma.done.wait (%p905_p9), %s664_s29, 128  }
 0x176   : > { %1164 = vsyncadd (%p905_p9), %s664_s29, 4294967168  ;;  %s1537_s22 = sadd.s32 4294967294, %s1183_s21  }
 0x177   : > { %s672_s11 = sand.u32 1, %s1537_s22  }
 0x178   : > { %s673_s7 = scalar_lea.sflag [#allocation10], %s672_s11 }
 0x179   : > { %1166 = dma.done.wait (%p905_p9), %s673_s7, 1280  }
 0x17a   : > { %1168 = vsyncadd (%p905_p9), %s673_s7, 4294966016  ;;  %p23_p10 = scmp.ge.s32.totalorder %s1304_s15, 4   ;;  %s1538_s18 = smov %s1175_s19 }
 0x17b   : > { %s1539_s19 = smov %s1179_s20  ;;  %s1540_s20 = smov %s1320_s28 }
 0x17c   : > { %s1541_s21 = smov %s1304_s15  ;;  %25 = sbr.rel (!%p23_p10) target bundleno = 8 (0x8), region = 117 }
 0x181   :  { %687 = vsyncpa [#allocation3], 1 }
 0x182   :  { %689 = vsyncpa [#allocation3 + $0x1], 1 }
 0x183   :  { %690 = vsyncpa [#allocation6], 1 }
 0x184   :  { %691 = vsyncpa [#allocation4], 1 }
 0x185   :  { %693 = vsyncpa [#allocation4 + $0x1], 1 }
 0x186   :  { %694 = vsyncpa [#allocation10], 1 }
 0x187   :  { %696 = vsyncpa [#allocation10 + $0x1], 1 }

</bundles_post_ra>
